<compile_context>
chip_gen: v5e
topology: v5e:2x2
jax: 0.10.0
libtpu: 0.0.40
codegen_flags: <defaults>
</compile_context>

<pallas_src>
import jax
import jax.numpy as jnp
from jax.experimental import pallas as pl
from jax.experimental.pallas import tpu as pltpu


def _copy_kernel(x_ref, o_ref):
    # Pure lane-dense identity copy of one (TB, TF) slab.
    o_ref[...] = x_ref[...]


def _pick_tiles(B: int, feat: int, itemsize: int):
    """Choose (TB, TF) block shape.

    Invariants:
      * TF is either the full feature extent or a multiple of 128 (lane-dense).
      * TB is either the full batch extent or a multiple of the dtype's native
        sublane tile (8 for 32-bit, 16 for 16-bit, 32 for 8-bit).
      * TB * TF * itemsize <= max_block_bytes, so double-buffered in+out
        residency (4 * block) stays <= ~24 MiB on every generation.
    """
    sub = 8 * max(1, 4 // itemsize)      # dtype-native sublane multiple
    target_bytes = 4 << 20               # ~4 MiB blocks: <10% step overhead on v7x
    max_block_bytes = 6 << 20            # hard cap -> 4 * block <= 24 MiB resident

    # ---- feature (lane) axis ----
    # Keep feat whole only if a minimum-height (sub rows) slab of the full
    # width fits the cap; otherwise tile feat in 128-lane multiples and let
    # pl.cdiv produce a masked ragged final block.
    if sub * feat * itemsize <= max_block_bytes:
        tf = feat
    else:
        tf = (max_block_bytes // (sub * itemsize)) // 128 * 128
        tf = max(128, min(tf, feat))

    # ---- batch (sublane) axis ----
    row_bytes = max(1, tf * itemsize)
    rows = max(1, target_bytes // row_bytes)
    if rows >= B:
        tb = B                            # full extent -> always a legal block shape
    else:
        tb = max(sub, (rows // sub) * sub)
        tb = min(tb, B)

    # Defensive: re-check the cap after sublane rounding.
    while tb > sub and tb * tf * itemsize > max_block_bytes:
        tb = max(sub, ((tb // 2) // sub) * sub)

    # ---- megacore: force >= 2 grid steps for non-trivial tensors ----
    total_bytes = B * feat * itemsize
    grid_steps = pl.cdiv(B, tb) * pl.cdiv(feat, tf)
    if grid_steps < 2 and total_bytes >= (4 << 20):
        if B >= 2 * sub:
            tb = max(sub, (B // 2 // sub) * sub)        # split batch into >=2 slabs
        elif feat >= 256:
            tf = max(128, (feat // 2 // 128) * 128)     # otherwise split features

    return tb, tf


def flatten(x: jax.Array) -> jax.Array:
    """Pallas equivalent of Flatten.forward: (B, d1, d2, ...) -> (B, prod(d_i))."""
    B = x.shape[0]
    feat = 1
    for d in x.shape[1:]:
        feat *= d

    # Free, metadata-only reshape in the wrapper (contiguous trailing dims).
    x2 = x.reshape(B, feat)

    itemsize = jnp.dtype(x.dtype).itemsize
    tb, tf = _pick_tiles(B, feat, itemsize)

    grid = (pl.cdiv(B, tb), pl.cdiv(feat, tf))

    # Scoped-VMEM budget: 2 double-buffered inputs + 2 outputs of one block,
    # plus ~30% headroom; floor at 16 MiB, capped below v7x's 64 MiB physical.
    block_bytes = tb * tf * itemsize
    vmem_limit = int(4 * block_bytes * 1.3) + (2 << 20)
    vmem_limit = max(16 << 20, min(vmem_limit, 60 << 20))

    return pl.pallas_call(
        _copy_kernel,
        out_shape=jax.ShapeDtypeStruct((B, feat), x.dtype),
        grid_spec=pltpu.PrefetchScalarGridSpec(
            num_scalar_prefetch=0,
            grid=grid,
            in_specs=[pl.BlockSpec((tb, tf), lambda b, f: (b, f))],
            out_specs=pl.BlockSpec((tb, tf), lambda b, f: (b, f)),
        ),
        compiler_params=pltpu.CompilerParams(
            dimension_semantics=("parallel", "parallel"),
            vmem_limit_bytes=vmem_limit,
        ),
    )(x2)


if __name__ == "__main__":
    key = jax.random.PRNGKey(0)
    # Small NCHW input consistent with a conv feature map: (batch, C, H, W).
    x = jax.random.normal(key, (2, 4, 16, 16), dtype=jnp.float32)

    out = flatten(x)
    out = jax.block_until_ready(out)

    # Reference: plain JAX reshape (same semantics as torch .view(B, -1)).
    ref = x.reshape(x.shape[0], -1)
    assert out.shape == (2, 4 * 16 * 16), out.shape
    assert out.dtype == x.dtype
    assert jnp.array_equal(out, ref), "mismatch vs reference flatten"

    print("KERNEL_OK")
</pallas_src>

<mosaic_0001>
module attributes {stable_mosaic.version = 11 : i64} {
  func.func @_copy_kernel(%arg0: i32, %arg1: i32, %arg2: memref<2x1024xf32, #tpu.memory_space<vmem>>, %arg3: memref<2x1024xf32, #tpu.memory_space<vmem>>) attributes {dimension_semantics = [#tpu.dimension_semantics<parallel>, #tpu.dimension_semantics<parallel>], iteration_bounds = array<i64: 1, 1>, scalar_prefetch = 0 : i64, scratch_operands = 0 : i64, tpu.core_type = #tpu.core_type<tc>, window_params = [{transform_indices = @transform_0, window_bounds = array<i64: 2, 1024>}, {transform_indices = @transform_1, window_bounds = array<i64: 2, 1024>}]} {
    %c0 = arith.constant 0 : index
    %c0_0 = arith.constant 0 : index
    %0 = vector.load %arg2[%c0, %c0_0] : memref<2x1024xf32, #tpu.memory_space<vmem>>, vector<2x1024xf32>
    %c0_1 = arith.constant 0 : index
    %c0_2 = arith.constant 0 : index
    %1 = vector.load %arg3[%c0_1, %c0_2] : memref<2x1024xf32, #tpu.memory_space<vmem>>, vector<2x1024xf32>
    tpu.vector_store %arg3[%c0_1, %c0_2], %0 {strides = array<i32>} : memref<2x1024xf32, #tpu.memory_space<vmem>>, vector<2x1024xf32>,
    return
  }
  func.func @transform_0(%arg0: i32, %arg1: i32) -> (i32, i32) {
    %c0_i32 = arith.constant 0 : i32
    return %arg0, %arg1 : i32, i32
  }
  func.func @transform_1(%arg0: i32, %arg1: i32) -> (i32, i32) {
    %c0_i32 = arith.constant 0 : i32
    return %arg0, %arg1 : i32, i32
  }
}

</mosaic_0001>

<bundles_post_ra>
// kernel: tpu_custom_call.1
= control target key start
LH: loop header
LB: loop body
LE: loop exit
PB: predicated region body
PF: predicated region fallthrough
CT: control target
= control target key end

     0   :  { %6 = vsyncpa [#allocation3], 0  ;;  %s116_s0 = inlined_call_operand.hbm [shape: f32[2,1024], index: 0, kind: input, shape index: {}]   ;;  %s117_s1 = inlined_call_operand.hbm [shape: f32[2,1024], index: 1, kind: output, shape index: {}]  }
   0x1   :  { %7 = vsyncpa [#allocation4], 0  ;;  %s13_s8 = sshll.u32 %s116_s0, 4  ;;  %s98_s9 = smov [#allocation2]   ;;  %s14_s8 = int_to_ptr.hbm [resolvable:$true] %s13_s8 }
   0x2   :  { %s15_s10 = sshll.u32 %s98_s9, 4  ;;  %s16_s10 = int_to_ptr.vmem [resolvable:$true] %s15_s10 }
   0x3   :  { %18 = dma.hbm_to_vmem [thread:$0]  %s14_s8, 256, %s16_s10, [#allocation3]  }
   0x4   :  { %94 = dma.done.wait [#allocation3], 256  }
   0x5   :  { %95 = vsyncadd [#allocation3], 4294967040  ;;  %s99_s11 = smov [#allocation5]   ;;  %s34_s15 = sshll.u32 %s117_s1, 4  ;;  %v23_v0 = vld [vmem:[#allocation2] sm:$0xff]  ;;  %v24_v1 = vld [vmem:[#allocation2 + $0x8] sm:$0xff]  ;;  %s35_s15 = int_to_ptr.hbm [resolvable:$true] %s34_s15 }
   0x6   :  { %s32_s12 = sshll.u32 %s99_s11, 4  ;;  %25 = vst [vmem:[#allocation5] sm:$0xff] %v23_v0  ;;  %s33_s12 = int_to_ptr.vmem [resolvable:$true] %s32_s12 }
   0x7   :  { %26 = vst [vmem:[#allocation5 + $0x8] sm:$0xff] %v24_v1 }
   0x8   :  { %37 = dma.vmem_to_hbm [thread:$0]  %s33_s12, 256, %s35_s15, [#allocation4]  }
   0x9   :  { %96 = dma.done.wait [#allocation4], 256  }
   0xa   :  { %97 = vsyncadd [#allocation4], 4294967040 }
   0xb   :  { %42 = vsyncpa [#allocation3], 1 }
   0xc   :  { %43 = vsyncpa [#allocation4], 1 }

</bundles_post_ra>
